<compile_context>
chip_gen: v5e
topology: v5e:2x2
jax: 0.10.0
libtpu: 0.0.40
codegen_flags: <defaults>
</compile_context>

<pallas_src>
import jax
import jax.numpy as jnp
from jax.experimental import pallas as pl
from jax.experimental.pallas import tpu as pltpu


def _round_up(n, m):
    return ((n + m - 1) // m) * m


def _prelu(x, alpha):
    return jnp.where(x >= 0, x, alpha * x)


# --------------------------------------------------------------------------- #
# Kernel
# --------------------------------------------------------------------------- #
def tac_kernel(x_ref, w1_ref, b1_ref, w2_ref, b2_ref,
               w3t_ref, w3b_ref, b3_ref, a_ref, o_ref):
    """One (TM, C*F) lane-dense slab in -> one (TM, C*F) lane-dense slab out."""
    cdt = w1_ref.dtype                       # compute dtype (bf16 or f32)

    # Hoisted SMEM scalar reads for the PReLU slopes (one load each).
    a1 = a_ref[0].astype(cdt)
    a2 = a_ref[1].astype(cdt)
    a3 = a_ref[2].astype(cdt)

    # In-kernel cast: the HBM copy of x stays producer-native (f32 here); the
    # cast rides the VPU while the next tile's DMA is in flight.
    x = x_ref[...].astype(cdt)               # (TM, C*F)

    # transform: block-diagonal Linear(C*F -> C*3H), f32 MXU accumulation,
    # then bias + PReLU in the compute dtype (bf16 epilogue on v6e/v7x).
    h = jnp.dot(x, w1_ref[...], preferred_element_type=jnp.float32).astype(cdt)
    h = _prelu(h + b1_ref[...], a1)          # (TM, C*3H)

    # average: stacked Linear(C*3H -> 3H) with 1/C folded into the weights
    #          == channel mean followed by Linear(3H -> 3H).
    m = jnp.dot(h, w2_ref[...], preferred_element_type=jnp.float32).astype(cdt)
    m = _prelu(m + b2_ref[...], a2)          # (TM, 3H)

    # concat: cat([h, mean]) @ W3 == h @ blockdiag(W3_top) + m @ tile(W3_bot)
    y = (jnp.dot(h, w3t_ref[...], preferred_element_type=jnp.float32)
         + jnp.dot(m, w3b_ref[...], preferred_element_type=jnp.float32)).astype(cdt)
    y = _prelu(y + b3_ref[...], a3)          # (TM, C*F)
    o_ref[...] = y.astype(o_ref.dtype)       # unmasked 128-lane stores


# --------------------------------------------------------------------------- #
# One-time lane-dense weight repack (pure JAX, outside the kernel)
# --------------------------------------------------------------------------- #
def pack_params(params, channels, compute_dtype):
    C = channels
    w1, b1 = params["w1"], params["b1"]            # (F, 3H), (1, 3H)
    w2, b2 = params["w2"], params["b2"]            # (3H, 3H), (1, 3H)
    w3t, w3b, b3 = params["w3_top"], params["w3_bot"], params["b3"]
    eye = jnp.eye(C, dtype=jnp.float32)
    return {
        "w1": jnp.kron(eye, w1).astype(compute_dtype),         # (C*F, C*3H) block-diag
        "b1": jnp.tile(b1, (1, C)).astype(compute_dtype),      # (1, C*3H)
        "w2": jnp.tile(w2 / C, (C, 1)).astype(compute_dtype),  # (C*3H, 3H), mean folded in
        "b2": b2.astype(compute_dtype),                        # (1, 3H)
        "w3t": jnp.kron(eye, w3t).astype(compute_dtype),       # (C*3H, C*F) block-diag
        "w3b": jnp.tile(w3b, (1, C)).astype(compute_dtype),    # (3H, C*F)
        "b3": jnp.tile(b3, (1, C)).astype(compute_dtype),      # (1, C*F)
        "alphas": params["alphas"].astype(jnp.float32),        # (3,) -> SMEM
    }


# --------------------------------------------------------------------------- #
# Forward wrapper
# --------------------------------------------------------------------------- #
def tac_forward(x, params, *, tm=1024, compute_dtype=jnp.bfloat16, out_dtype=None):
    """x: (B, T, C, F).  Returns (B, T, C, F) in out_dtype (default: x.dtype)."""
    B, T, C, F = x.shape
    out_dtype = jnp.dtype(out_dtype if out_dtype is not None else x.dtype)
    N = B * T
    CF = C * F
    H3 = params["w1"].shape[1]
    CH3 = C * H3

    packed = pack_params(params, C, compute_dtype)

    # Row tile: multiple of 16 (bf16 (16,128) min tile), capped so the grid
    # keeps >= ~8 steps (>= 2 per TensorCore on v7x megacore -> per-core
    # double-buffering) while staying in the 512-1024 sweet spot at large N.
    tm = min(_round_up(tm, 16), 1024)
    tm = min(tm, max(16, _round_up(pl.cdiv(N, 8), 16)))

    # Metadata-only reshape; no cast, no pad, no extra HBM pass over x.
    xf = x.reshape(N, CF)
    grid = (pl.cdiv(N, tm),)   # ragged tail -> Pallas partial block; rows are
                               # independent, so garbage in the padded read
                               # region never reaches a valid output row.

    # Useful (non-zero-block) FLOPs only.
    flops = 2 * N * (C * F * H3      # transform: non-zero blocks of kron(eye, w1)
                     + CH3 * H3      # stacked average (dense, mean folded in)
                     + C * H3 * F    # concat-top: non-zero blocks of kron(eye, w3t)
                     + H3 * CF)      # concat-bottom (dense, lane-tiled)
    bytes_accessed = int(
        N * CF * x.dtype.itemsize
        + N * CF * out_dtype.itemsize
        + sum(int(v.size) * v.dtype.itemsize for v in packed.values()))
    cost = pl.CostEstimate(flops=int(flops), transcendentals=0,
                           bytes_accessed=bytes_accessed)

    # VMEM at tm=1024: <= 0.5 MiB in + <= 0.5 MiB out per tile, double-buffered
    # ~2 MiB plus tiny weights — well inside every generation's default scoped
    # VMEM limit, so it is left alone.  (pipeline_mode=pl.Buffered(3) on the
    # input/output specs is a further knob if a v5e profile shows exposed DMA.)
    out = pl.pallas_call(
        tac_kernel,
        out_shape=jax.ShapeDtypeStruct((N, CF), out_dtype),
        grid_spec=pltpu.PrefetchScalarGridSpec(
            num_scalar_prefetch=0,
            grid=grid,
            in_specs=[
                pl.BlockSpec((tm, CF), lambda i: (i, 0)),     # lane-dense input slab
                pl.BlockSpec((CF, CH3), lambda i: (0, 0)),    # w1 (block-diag)
                pl.BlockSpec((1, CH3), lambda i: (0, 0)),     # b1
                pl.BlockSpec((CH3, H3), lambda i: (0, 0)),    # w2 (stacked / mean)
                pl.BlockSpec((1, H3), lambda i: (0, 0)),      # b2
                pl.BlockSpec((CH3, CF), lambda i: (0, 0)),    # w3 top (block-diag)
                pl.BlockSpec((H3, CF), lambda i: (0, 0)),     # w3 bottom (tiled)
                pl.BlockSpec((1, CF), lambda i: (0, 0)),      # b3
                pl.BlockSpec(memory_space=pltpu.MemorySpace.SMEM),  # PReLU slopes (3,)
            ],
            out_specs=pl.BlockSpec((tm, CF), lambda i: (i, 0)),
        ),
        compiler_params=pltpu.CompilerParams(
            dimension_semantics=("parallel",)),
        cost_estimate=cost,
    )(xf, packed["w1"], packed["b1"], packed["w2"], packed["b2"],
      packed["w3t"], packed["w3b"], packed["b3"], packed["alphas"])

    return out.reshape(B, T, C, F)


# --------------------------------------------------------------------------- #
# Pure-JAX reference of the PyTorch forward (num_mics=None) and params
# --------------------------------------------------------------------------- #
def tac_reference(x, params):
    B, T, C, F = x.shape
    w1, b1 = params["w1"], params["b1"]
    w2, b2 = params["w2"], params["b2"]
    w3t, w3b, b3 = params["w3_top"], params["w3_bot"], params["b3"]
    a1, a2, a3 = params["alphas"]

    h = x.reshape(-1, F) @ w1 + b1
    h = _prelu(h, a1)
    h = h.reshape(B, T, C, -1)
    m = h.mean(axis=2)
    m = m @ w2 + b2
    m = _prelu(m, a2)
    m_b = jnp.broadcast_to(m[:, :, None, :], h.shape)
    cat = jnp.concatenate([h, m_b], axis=-1)
    y = cat.reshape(-1, cat.shape[-1]) @ jnp.concatenate([w3t, w3b], axis=0) + b3
    y = _prelu(y, a3)
    return y.reshape(B, T, C, F)


def init_params(key, input_size, hidden_size):
    H3 = hidden_size * 3
    ks = jax.random.split(key, 6)
    # Deterministic synthetic parameters (stored as (in_features, out_features)).
    w1 = jax.random.normal(ks[0], (input_size, H3), jnp.float32) * 0.1
    b1 = jax.random.normal(ks[1], (1, H3), jnp.float32) * 0.1
    w2 = jax.random.normal(ks[2], (H3, H3), jnp.float32) * 0.1
    b2 = jax.random.normal(ks[3], (1, H3), jnp.float32) * 0.1
    w3 = jax.random.normal(ks[4], (2 * H3, input_size), jnp.float32) * 0.1
    b3 = jax.random.normal(ks[5], (1, input_size), jnp.float32) * 0.1
    alphas = jnp.full((3,), 0.25, jnp.float32)   # nn.PReLU() default init
    return {
        "w1": w1, "b1": b1,
        "w2": w2, "b2": b2,
        "w3_top": w3[:H3], "w3_bot": w3[H3:], "b3": b3,
        "alphas": alphas,
    }


if __name__ == "__main__":
    # Small shapes: batch=2, time=8, channels=4 mics, input_size=32, hidden=16
    # (channels * input_size = 128 -> lane-dense slabs).
    B, T, C = 2, 8, 4
    input_size, hidden_size = 32, 16

    key = jax.random.PRNGKey(0)
    k_x, k_p = jax.random.split(key)
    x = jax.random.normal(k_x, (B, T, C, input_size), jnp.float32)
    params = init_params(k_p, input_size, hidden_size)

    ref = tac_reference(x, params)

    # f32 compute / f32 out: strict check against the pure-JAX reference.
    out_f32 = jax.block_until_ready(
        tac_forward(x, params, compute_dtype=jnp.float32))
    assert out_f32.shape == (B, T, C, input_size)
    assert jnp.allclose(out_f32, ref, atol=2e-4, rtol=2e-4), "f32 mismatch vs reference"

    # bf16 compute / f32 out (bf16 weights + bf16 epilogues): looser tolerance.
    out_bf16 = jax.block_until_ready(
        tac_forward(x, params, compute_dtype=jnp.bfloat16))
    assert out_bf16.shape == (B, T, C, input_size)
    assert jnp.allclose(out_bf16, ref, atol=7e-2, rtol=7e-2), "bf16 mismatch vs reference"

    # bf16 compute / bf16 out (also halves write-side HBM traffic).
    out_bf16o = jax.block_until_ready(
        tac_forward(x, params, compute_dtype=jnp.bfloat16, out_dtype=jnp.bfloat16))
    assert out_bf16o.dtype == jnp.bfloat16
    assert jnp.allclose(out_bf16o.astype(jnp.float32), ref, atol=7e-2, rtol=7e-2), \
        "bf16-out mismatch vs reference"

    print("KERNEL_OK")
</pallas_src>

<mosaic_0001>
module attributes {stable_mosaic.version = 11 : i64} {
  func.func @tac_kernel(%arg0: i32, %arg1: memref<16x128xf32, #tpu.memory_space<vmem>>, %arg2: memref<128x192xf32, #tpu.memory_space<vmem>>, %arg3: memref<1x192xf32, #tpu.memory_space<vmem>>, %arg4: memref<192x48xf32, #tpu.memory_space<vmem>>, %arg5: memref<1x48xf32, #tpu.memory_space<vmem>>, %arg6: memref<192x128xf32, #tpu.memory_space<vmem>>, %arg7: memref<48x128xf32, #tpu.memory_space<vmem>>, %arg8: memref<1x128xf32, #tpu.memory_space<vmem>>, %arg9: memref<3xf32, #tpu.memory_space<smem>>, %arg10: memref<16x128xf32, #tpu.memory_space<vmem>>) attributes {dimension_semantics = [#tpu.dimension_semantics<parallel>], iteration_bounds = array<i64: 1>, scalar_prefetch = 0 : i64, scratch_operands = 0 : i64, tpu.core_type = #tpu.core_type<tc>, window_params = [{transform_indices = @transform_0, window_bounds = array<i64: 16, 128>}, {pipeline_mode = #tpu.pipeline_mode<synchronous>, transform_indices = @transform_1, window_bounds = array<i64: 128, 192>}, {pipeline_mode = #tpu.pipeline_mode<synchronous>, transform_indices = @transform_2, window_bounds = array<i64: 1, 192>}, {pipeline_mode = #tpu.pipeline_mode<synchronous>, transform_indices = @transform_3, window_bounds = array<i64: 192, 48>}, {pipeline_mode = #tpu.pipeline_mode<synchronous>, transform_indices = @transform_4, window_bounds = array<i64: 1, 48>}, {pipeline_mode = #tpu.pipeline_mode<synchronous>, transform_indices = @transform_5, window_bounds = array<i64: 192, 128>}, {pipeline_mode = #tpu.pipeline_mode<synchronous>, transform_indices = @transform_6, window_bounds = array<i64: 48, 128>}, {pipeline_mode = #tpu.pipeline_mode<synchronous>, transform_indices = @transform_7, window_bounds = array<i64: 1, 128>}, {transform_indices = @transform_8, window_bounds = array<i64: 3>}, {transform_indices = @transform_9, window_bounds = array<i64: 16, 128>}]} {
    %c0 = arith.constant 0 : index
    %0 = memref.load %arg9[%c0] : memref<3xf32, #tpu.memory_space<smem>>
    %c1 = arith.constant 1 : index
    %1 = memref.load %arg9[%c1] : memref<3xf32, #tpu.memory_space<smem>>
    %c2 = arith.constant 2 : index
    %2 = memref.load %arg9[%c2] : memref<3xf32, #tpu.memory_space<smem>>
    %c0_0 = arith.constant 0 : index
    %c0_1 = arith.constant 0 : index
    %3 = vector.load %arg1[%c0_0, %c0_1] : memref<16x128xf32, #tpu.memory_space<vmem>>, vector<16x128xf32>
    %c0_2 = arith.constant 0 : index
    %c0_3 = arith.constant 0 : index
    %4 = vector.load %arg2[%c0_2, %c0_3] : memref<128x192xf32, #tpu.memory_space<vmem>>, vector<128x192xf32>
    %cst = arith.constant dense<0.000000e+00> : vector<16x192xf32>
    %5 = tpu.matmul %3, %4, %cst {dimension_numbers = #tpu.dot_dimension_numbers<[1], [0], [0], [1], [0, 0, 1, 1], [], []>} : vector<16x128xf32>, vector<128x192xf32>, vector<16x192xf32> -> vector<16x192xf32>
    %c0_4 = arith.constant 0 : index
    %c0_5 = arith.constant 0 : index
    %6 = vector.load %arg3[%c0_4, %c0_5] : memref<1x192xf32, #tpu.memory_space<vmem>>, vector<1x192xf32>
    %7 = vector.broadcast %6 : vector<1x192xf32> to vector<16x192xf32>
    %8 = arith.addf %5, %7 : vector<16x192xf32>
    %cst_6 = arith.constant 0.000000e+00 : f32
    %9 = vector.broadcast %cst_6 : f32 to vector<16x192xf32>
    %10 = arith.cmpf oge, %8, %9 : vector<16x192xf32>
    %11 = vector.broadcast %0 : f32 to vector<16x192xf32>
    %12 = arith.mulf %11, %8 : vector<16x192xf32>
    %13 = arith.select %10, %8, %12 : vector<16x192xi1>, vector<16x192xf32>
    %c0_7 = arith.constant 0 : index
    %c0_8 = arith.constant 0 : index
    %14 = vector.load %arg4[%c0_7, %c0_8] : memref<192x48xf32, #tpu.memory_space<vmem>>, vector<192x48xf32>
    %cst_9 = arith.constant dense<0.000000e+00> : vector<16x48xf32>
    %15 = tpu.matmul %13, %14, %cst_9 {dimension_numbers = #tpu.dot_dimension_numbers<[1], [0], [0], [1], [0, 0, 1, 1], [], []>} : vector<16x192xf32>, vector<192x48xf32>, vector<16x48xf32> -> vector<16x48xf32>
    %c0_10 = arith.constant 0 : index
    %c0_11 = arith.constant 0 : index
    %16 = vector.load %arg5[%c0_10, %c0_11] : memref<1x48xf32, #tpu.memory_space<vmem>>, vector<1x48xf32>
    %17 = vector.broadcast %16 : vector<1x48xf32> to vector<16x48xf32>
    %18 = arith.addf %15, %17 : vector<16x48xf32>
    %cst_12 = arith.constant 0.000000e+00 : f32
    %19 = vector.broadcast %cst_12 : f32 to vector<16x48xf32>
    %20 = arith.cmpf oge, %18, %19 : vector<16x48xf32>
    %21 = vector.broadcast %1 : f32 to vector<16x48xf32>
    %22 = arith.mulf %21, %18 : vector<16x48xf32>
    %23 = arith.select %20, %18, %22 : vector<16x48xi1>, vector<16x48xf32>
    %c0_13 = arith.constant 0 : index
    %c0_14 = arith.constant 0 : index
    %24 = vector.load %arg6[%c0_13, %c0_14] : memref<192x128xf32, #tpu.memory_space<vmem>>, vector<192x128xf32>
    %cst_15 = arith.constant dense<0.000000e+00> : vector<16x128xf32>
    %25 = tpu.matmul %13, %24, %cst_15 {dimension_numbers = #tpu.dot_dimension_numbers<[1], [0], [0], [1], [0, 0, 1, 1], [], []>} : vector<16x192xf32>, vector<192x128xf32>, vector<16x128xf32> -> vector<16x128xf32>
    %c0_16 = arith.constant 0 : index
    %c0_17 = arith.constant 0 : index
    %26 = vector.load %arg7[%c0_16, %c0_17] : memref<48x128xf32, #tpu.memory_space<vmem>>, vector<48x128xf32>
    %cst_18 = arith.constant dense<0.000000e+00> : vector<16x128xf32>
    %27 = tpu.matmul %23, %26, %cst_18 {dimension_numbers = #tpu.dot_dimension_numbers<[1], [0], [0], [1], [0, 0, 1, 1], [], []>} : vector<16x48xf32>, vector<48x128xf32>, vector<16x128xf32> -> vector<16x128xf32>
    %28 = arith.addf %25, %27 : vector<16x128xf32>
    %c0_19 = arith.constant 0 : index
    %c0_20 = arith.constant 0 : index
    %29 = vector.load %arg8[%c0_19, %c0_20] : memref<1x128xf32, #tpu.memory_space<vmem>>, vector<1x128xf32>
    %30 = vector.broadcast %29 : vector<1x128xf32> to vector<16x128xf32>
    %31 = arith.addf %28, %30 : vector<16x128xf32>
    %cst_21 = arith.constant 0.000000e+00 : f32
    %32 = vector.broadcast %cst_21 : f32 to vector<16x128xf32>
    %33 = arith.cmpf oge, %31, %32 : vector<16x128xf32>
    %34 = vector.broadcast %2 : f32 to vector<16x128xf32>
    %35 = arith.mulf %34, %31 : vector<16x128xf32>
    %36 = arith.select %33, %31, %35 : vector<16x128xi1>, vector<16x128xf32>
    %c0_22 = arith.constant 0 : index
    %c0_23 = arith.constant 0 : index
    %37 = vector.load %arg10[%c0_22, %c0_23] : memref<16x128xf32, #tpu.memory_space<vmem>>, vector<16x128xf32>
    tpu.vector_store %arg10[%c0_22, %c0_23], %36 {strides = array<i32>} : memref<16x128xf32, #tpu.memory_space<vmem>>, vector<16x128xf32>,
    return
  }
  func.func @transform_0(%arg0: i32) -> (i32, i32) {
    %c0_i32 = arith.constant 0 : i32
    %c0_i32_0 = arith.constant 0 : i32
    return %arg0, %c0_i32 : i32, i32
  }
  func.func @transform_1(%arg0: i32) -> (i32, i32) {
    %c0_i32 = arith.constant 0 : i32
    %c0_i32_0 = arith.constant 0 : i32
    %c0_i32_1 = arith.constant 0 : i32
    return %c0_i32, %c0_i32_0 : i32, i32
  }
  func.func @transform_2(%arg0: i32) -> (i32, i32) {
    %c0_i32 = arith.constant 0 : i32
    %c0_i32_0 = arith.constant 0 : i32
    %c0_i32_1 = arith.constant 0 : i32
    return %c0_i32, %c0_i32_0 : i32, i32
  }
  func.func @transform_3(%arg0: i32) -> (i32, i32) {
    %c0_i32 = arith.constant 0 : i32
    %c0_i32_0 = arith.constant 0 : i32
    %c0_i32_1 = arith.constant 0 : i32
    return %c0_i32, %c0_i32_0 : i32, i32
  }
  func.func @transform_4(%arg0: i32) -> (i32, i32) {
    %c0_i32 = arith.constant 0 : i32
    %c0_i32_0 = arith.constant 0 : i32
    %c0_i32_1 = arith.constant 0 : i32
    return %c0_i32, %c0_i32_0 : i32, i32
  }
  func.func @transform_5(%arg0: i32) -> (i32, i32) {
    %c0_i32 = arith.constant 0 : i32
    %c0_i32_0 = arith.constant 0 : i32
    %c0_i32_1 = arith.constant 0 : i32
    return %c0_i32, %c0_i32_0 : i32, i32
  }
  func.func @transform_6(%arg0: i32) -> (i32, i32) {
    %c0_i32 = arith.constant 0 : i32
    %c0_i32_0 = arith.constant 0 : i32
    %c0_i32_1 = arith.constant 0 : i32
    return %c0_i32, %c0_i32_0 : i32, i32
  }
  func.func @transform_7(%arg0: i32) -> (i32, i32) {
    %c0_i32 = arith.constant 0 : i32
    %c0_i32_0 = arith.constant 0 : i32
    %c0_i32_1 = arith.constant 0 : i32
    return %c0_i32, %c0_i32_0 : i32, i32
  }
  func.func @transform_8(%arg0: i32) -> i32 {
    %c0_i32 = arith.constant 0 : i32
    %c0_i32_0 = arith.constant 0 : i32
    return %c0_i32 : i32
  }
  func.func @transform_9(%arg0: i32) -> (i32, i32) {
    %c0_i32 = arith.constant 0 : i32
    %c0_i32_0 = arith.constant 0 : i32
    return %arg0, %c0_i32 : i32, i32
  }
}

</mosaic_0001>

<bundles_post_ra>
// kernel: tpu_custom_call.1
= control target key start
LH: loop header
LB: loop body
LE: loop exit
PB: predicated region body
PF: predicated region fallthrough
CT: control target
= control target key end

     0   :  { %14 = vsyncpa [#allocation4], 0  ;;  %s783_s0 = inlined_call_operand.vmem [shape: f32[16,128], index: 0, kind: input, shape index: {}]   ;;  %s784_s1 = inlined_call_operand.vmem [shape: f32[128,192], index: 1, kind: input, shape index: {}]   ;;  %s785_s2 = inlined_call_operand.vmem [shape: f32[1,192], index: 2, kind: input, shape index: {}]   ;;  %s786_s3 = inlined_call_operand.vmem [shape: f32[192,48], index: 3, kind: input, shape index: {}]   ;;  %s787_s4 = inlined_call_operand.vmem [shape: f32[1,48], index: 4, kind: input, shape index: {}]   ;;  %s788_s5 = inlined_call_operand.vmem [shape: f32[192,128], index: 5, kind: input, shape index: {}]   ;;  %s789_s6 = inlined_call_operand.vmem [shape: f32[48,128], index: 6, kind: input, shape index: {}]   ;;  %s790_s7 = inlined_call_operand.vmem [shape: f32[1,128], index: 7, kind: input, shape index: {}]   ;;  %s791_s8 = inlined_call_operand.vmem [shape: f32[3], index: 8, kind: input, shape index: {}]   ;;  %s792_s9 = inlined_call_operand.hbm [shape: f32[16,128], index: 9, kind: output, shape index: {}]  }
   0x1   :  { %15 = vsyncpa [#allocation3], 0  ;;  %s37_s11 = sshll.u32 %s791_s8, 4  ;;  %s446_s12 = smov [#allocation2]   ;;  %s38_s11 = int_to_ptr.vmem [resolvable:$true] %s37_s11 }
   0x2   :  { %40 = dma.vmem_to_smem %s38_s11, 16, %s446_s12, [#allocation4]  }
   0x3   :  { %442 = dma.done.wait [#allocation4], 16  }
   0x4   :  { %443 = vsyncadd [#allocation4], 4294967280 }
   0x5   :  { %45 = sfence }
   0x6   :  { %v81_v0 = vld [vmem:[%s784_s1 + $0xf0] sm:$0xff]  ;;  %v82_v1 = vld [vmem:[%s784_s1 + $0xf8] sm:$0xff]  ;;  %v79_v2 = vld [vmem:[%s784_s1 + $0xe0] sm:$0xff]  ;;  %vm176_vm0 = vcmask 523264   ;;  %s376_s27 = sld [smem:[#allocation2 + $0x1]]  ;;  %vm266_vm6 = vcmask 392192  }
   0x7   :  { %89 = vmatpush.msra.mxu0 %v81_v0  ;;  %112 = vmatpush.msra.mxu1 %v82_v1  ;;  %v80_v3 = vld [vmem:[%s784_s1 + $0xe8] sm:$0xff]  ;;  %v77_v4 = vld [vmem:[%s784_s1 + $0xd0] sm:$0xff]  ;;  %v78_v5 = vld [vmem:[%s784_s1 + $0xd8] sm:$0xff]  ;;  %s447_s10 = smov [#allocation5]   ;;  %s363_s14 = sshll.u32 %s792_s9, 4  ;;  %s364_s14 = int_to_ptr.hbm [resolvable:$true] %s363_s14 }
   0x8   :  { %v75_v6 = vld [vmem:[%s784_s1 + $0xc0] sm:$0xff]  ;;  %v76_v7 = vld [vmem:[%s784_s1 + $0xc8] sm:$0xff]  ;;  %v73_v8 = vld [vmem:[%s784_s1 + $0xb0] sm:$0xff]  ;;  %s361_s11 = sshll.u32 %s447_s10, 4  ;;  %s449_s15 = smov 8   ;;  %s362_s11 = int_to_ptr.vmem [resolvable:$true] %s361_s11 }
   0x9   :  { %90 = vmatpush.msra.mxu0 %v79_v2  ;;  %113 = vmatpush.msra.mxu1 %v80_v3  ;;  %v74_v9 = vld [vmem:[%s784_s1 + $0xb8] sm:$0xff]  ;;  %v71_v10 = vld [vmem:[%s784_s1 + $0xa0] sm:$0xff]  ;;  %v72_v11 = vld [vmem:[%s784_s1 + $0xa8] sm:$0xff] }
   0xa   :  { %v69_v12 = vld [vmem:[%s784_s1 + $0x90] sm:$0xff]  ;;  %v70_v13 = vld [vmem:[%s784_s1 + $0x98] sm:$0xff]  ;;  %v67_v16 = vld [vmem:[%s784_s1 + $0x80] sm:$0xff] }
   0xb   :  { %91 = vmatpush.msra.mxu0 %v77_v4  ;;  %114 = vmatpush.msra.mxu1 %v78_v5  ;;  %v163_v14 = vld [vmem:[%s786_s3 + $0x78] sm:$0xff]  ;;  %v162_v15 = vld [vmem:[%s786_s3 + $0x70] sm:$0xff]  ;;  %v68_v17 = vld [vmem:[%s784_s1 + $0x88] sm:$0xff] }
   0xc   :  { %183 = vmatpush.msra.mxu2 %v163_v14  ;;  %v161_v18 = vld [vmem:[%s786_s3 + $0x68] sm:$0xff]  ;;  %v65_v19 = vld [vmem:[%s784_s1 + $0x70] sm:$0xff]  ;;  %v66_v20 = vld [vmem:[%s784_s1 + $0x78] sm:$0xff] }
   0xd   :  { %92 = vmatpush.msra.mxu0 %v75_v6  ;;  %115 = vmatpush.msra.mxu1 %v76_v7  ;;  %v160_v21 = vld [vmem:[%s786_s3 + $0x60] sm:$0xff]  ;;  %v64_v23 = vld [vmem:[%s784_s1 + $0x68] sm:$0xff]  ;;  %v159_v24 = vld [vmem:[%s786_s3 + $0x58] sm:$0xff] }
   0xe   :  { %184 = vmatpush.msra.mxu2 %v162_v15  ;;  %v63_v22 = vld [vmem:[%s784_s1 + $0x60] sm:$0xff]  ;;  %v61_v25 = vld [vmem:[%s784_s1 + $0x50] sm:$0xff]  ;;  %v62_v26 = vld [vmem:[%s784_s1 + $0x58] sm:$0xff] }
   0xf   :  { %93 = vmatpush.msra.mxu0 %v73_v8  ;;  %116 = vmatpush.msra.mxu1 %v74_v9  ;;  %v158_v27 = vld [vmem:[%s786_s3 + $0x50] sm:$0xff]  ;;  %v171_v28 = vld [vmem:[%s786_s3 + $0xb8] sm:$0xff]  ;;  %v59_v29 = vld [vmem:[%s784_s1 + $0x40] sm:$0xff] }
  0x10   :  { %185 = vmatpush.msra.mxu2 %v161_v18  ;;  %v60_v30 = vld [vmem:[%s784_s1 + $0x48] sm:$0xff]  ;;  %214 = vmatpush.msra.mxu3 %v171_v28  ;;  %v170_v31 = vld [vmem:[%s786_s3 + $0xb0] sm:$0xff]  ;;  %v58_v35 = vld [vmem:[%s784_s1 + $0x38] sm:$0xff] }
  0x11   :  { %94 = vmatpush.msra.mxu0 %v71_v10  ;;  %117 = vmatpush.msra.mxu1 %v72_v11  ;;  %v157_v32 = vld [vmem:[%s786_s3 + $0x48] sm:$0xff]  ;;  %v57_v34 = vld [vmem:[%s784_s1 + $0x30] sm:$0xff]  ;;  %v55_v36 = vld [vmem:[%s784_s1 + $0x20] sm:$0xff] }
  0x12   :  { %186 = vmatpush.msra.mxu2 %v160_v21  ;;  %v169_v33 = vld [vmem:[%s786_s3 + $0xa8] sm:$0xff]  ;;  %215 = vmatpush.msra.mxu3 %v170_v31  ;;  %v156_v37 = vld [vmem:[%s786_s3 + $0x40] sm:$0xff]  ;;  %v155_v40 = vld [vmem:[%s786_s3 + $0x38] sm:$0xff] }
  0x13   :  { %95 = vmatpush.msra.mxu0 %v69_v12  ;;  %118 = vmatpush.msra.mxu1 %v70_v13  ;;  %v168_v38 = vld [vmem:[%s786_s3 + $0xa0] sm:$0xff]  ;;  %v56_v39 = vld [vmem:[%s784_s1 + $0x28] sm:$0xff]  ;;  %v167_v41 = vld [vmem:[%s786_s3 + $0x98] sm:$0xff] }
  0x14   :  { %187 = vmatpush.msra.mxu2 %v159_v24  ;;  %216 = vmatpush.msra.mxu3 %v169_v33  ;;  %v53_v42 = vld [vmem:[%s784_s1 + $0x10] sm:$0xff]  ;;  %v54_v43 = vld [vmem:[%s784_s1 + $0x18] sm:$0xff]  ;;  %v51_v45 = vld [vmem:[%s784_s1] sm:$0xff] }
  0x15   :  { %96 = vmatpush.msra.mxu0 %v67_v16  ;;  %119 = vmatpush.msra.mxu1 %v68_v17  ;;  %v154_v44 = vld [vmem:[%s786_s3 + $0x30] sm:$0xff]  ;;  %v52_v46 = vld [vmem:[%s784_s1 + $0x8] sm:$0xff]  ;;  %v49_v47 = vld [vmem:[%s783_s0] sm:$0xff] }
  0x16   :  { %188 = vmatpush.msra.mxu2 %v158_v27  ;;  %217 = vmatpush.msra.mxu3 %v168_v38  ;;  %v251_v48 = vld [vmem:[%s788_s5 + $0x78] sm:$0xff]  ;;  %v153_v49 = vld [vmem:[%s786_s3 + $0x28] sm:$0xff]  ;;  %v250_v51 = vld [vmem:[%s788_s5 + $0x70] sm:$0xff] }
  0x17   :  { %97 = vmatpush.msra.mxu0 %v65_v19  ;;  %120 = vmatpush.msra.mxu1 %v66_v20  ;;  %v259_v50 = vld [vmem:[%s788_s5 + $0xb8] sm:$0xff]  ;;  %v152_v52 = vld [vmem:[%s786_s3 + $0x20] sm:$0xff]  ;;  %v258_v53 = vld [vmem:[%s788_s5 + $0xb0] sm:$0xff] }
  0x18   :  { %189 = vmatpush.msra.mxu2 %v157_v32  ;;  %218 = vmatpush.msra.mxu3 %v167_v41  ;;  %v249_v54 = vld [vmem:[%s788_s5 + $0x68] sm:$0xff]  ;;  %v151_v55 = vld [vmem:[%s786_s3 + $0x18] sm:$0xff]  ;;  %v248_v57 = vld [vmem:[%s788_s5 + $0x60] sm:$0xff] }
  0x19   :  { %98 = vmatpush.msra.mxu0 %v63_v22  ;;  %121 = vmatpush.msra.mxu1 %v64_v23  ;;  %v257_v56 = vld [vmem:[%s788_s5 + $0xa8] sm:$0xff]  ;;  %v150_v58 = vld [vmem:[%s786_s3 + $0x10] sm:$0xff]  ;;  %v247_v60 = vld [vmem:[%s788_s5 + $0x58] sm:$0xff] }
  0x1a   :  { %190 = vmatpush.msra.mxu2 %v156_v37  ;;  %v50_v59 = vld [vmem:[%s783_s0 + $0x8] sm:$0xff]  ;;  %v256_v62 = vld [vmem:[%s788_s5 + $0xa0] sm:$0xff]  ;;  %v246_v63 = vld [vmem:[%s788_s5 + $0x50] sm:$0xff] }
  0x1b   :  { %99 = vmatpush.msra.mxu0 %v61_v25  ;;  %122 = vmatpush.msra.mxu1 %v62_v26  ;;  %v149_v61 = vld [vmem:[%s786_s3 + $0x8] sm:$0xff]  ;;  %v148_v0 = vld [vmem:[%s786_s3] sm:$0xff]  ;;  %v255_v1 = vld [vmem:[%s788_s5 + $0x98] sm:$0xff] }
  0x1c   :  { %191 = vmatpush.msra.mxu2 %v155_v40  ;;  %v245_v2 = vld [vmem:[%s788_s5 + $0x48] sm:$0xff]  ;;  %v244_v3 = vld [vmem:[%s788_s5 + $0x40] sm:$0xff]  ;;  %v243_v4 = vld [vmem:[%s788_s5 + $0x38] sm:$0xff] }
  0x1d   :  { %100 = vmatpush.msra.mxu0 %v59_v29  ;;  %123 = vmatpush.msra.mxu1 %v60_v30  ;;  %v242_v5 = vld [vmem:[%s788_s5 + $0x30] sm:$0xff]  ;;  %v241_v6 = vld [vmem:[%s788_s5 + $0x28] sm:$0xff]  ;;  %v240_v7 = vld [vmem:[%s788_s5 + $0x20] sm:$0xff] }
  0x1e   :  { %192 = vmatpush.msra.mxu2 %v154_v44  ;;  %v239_v8 = vld [vmem:[%s788_s5 + $0x18] sm:$0xff]  ;;  %v166_v9 = vld [vmem:[%s786_s3 + $0x90] sm:$0xff]  ;;  %v165_v12 = vld [vmem:[%s786_s3 + $0x88] sm:$0xff] }
  0x1f   :  { %101 = vmatpush.msra.mxu0 %v57_v34  ;;  %124 = vmatpush.msra.mxu1 %v58_v35  ;;  %v238_v10 = vld [vmem:[%s788_s5 + $0x10] sm:$0xff]  ;;  %v237_v13 = vld [vmem:[%s788_s5 + $0x8] sm:$0xff]  ;;  %v164_v15 = vld [vmem:[%s786_s3 + $0x80] sm:$0xff]  ;;  %s46_s3 = sld [smem:[#allocation2]] }
  0x20   :  { %193 = vmatpush.msra.mxu2 %v153_v49  ;;  %v254_v11 = vld [vmem:[%s788_s5 + $0x90] sm:$0xff]  ;;  %219 = vmatpush.msra.mxu3 %v166_v9  ;;  %v253_v14 = vld [vmem:[%s788_s5 + $0x88] sm:$0xff]  ;;  %v236_v16 = vld [vmem:[%s788_s5] sm:$0xff] }
  0x21   :  { %102 = vmatpush.msra.mxu0 %v55_v36  ;;  %125 = vmatpush.msra.mxu1 %v56_v39  ;;  %v252_v17 = vld [vmem:[%s788_s5 + $0x80] sm:$0xff]  ;;  %v265_v18 = vld [vmem:[%s789_s6 + $0x28] sm:$0xff]  ;;  %v263_v40 = vld [vmem:[%s789_s6 + $0x18] sm:$0xff] }
  0x22   :  { %194 = vmatpush.msra.mxu2 %v152_v52  ;;  %220 = vmatpush.msra.mxu3 %v165_v12  ;;  %v83_v19 = vld [vmem:[%s785_s2] sm:$0x3]  ;;  %v262_v41 = vld [vmem:[%s789_s6 + $0x10] sm:$0xff] }
  0x23   :  { %103 = vmatpush.msra.mxu0 %v53_v42  ;;  %126 = vmatpush.msra.mxu1 %v54_v43  ;;  %v85_v20 = vperm.slane %v83_v19, 0  ;;  %v86_v21 = vperm.slane %v83_v19, 1  ;;  %v264_v39 = vld [vmem:[%s789_s6 + $0x20] sm:$0xff]  ;;  %v261_v42 = vld [vmem:[%s789_s6 + $0x8] sm:$0xff] }
  0x24   :  { %195 = vmatpush.msra.mxu2 %v151_v55  ;;  %221 = vmatpush.msra.mxu3 %v164_v15  ;;  %v260_v43 = vld [vmem:[%s789_s6] sm:$0xff]  ;;  %s377_s6 = sld [smem:[#allocation2 + $0x2]] }
  0x25   :  { %104 = vmatpush.msra.mxu0 %v51_v45  ;;  %127 = vmatpush.msra.mxu1 %v52_v46  ;;  %v139_v24 = vstv %s46_s3  ;;  %v404_v44 = vld [vmem:[%s787_s4] ss:$0 sm:$0xff] }
  0x26   :  { %105 = vmatmul.f32.vlgmr.msra.gmra.mxu0 %v49_v47  ;;  %128 = vmatmul.f32.vlgmr.msra.gmra.mxu1 %v49_v47 }
  0x27   :  { %296 = vmatpush.msrb.mxu0 %v251_v48  ;;  %327 = vmatpush.msrb.mxu1 %v259_v50 }
  0x28   :  { %196 = vmatpush.msra.mxu2 %v150_v58  ;;  %283 = vmatpush.msrb.mxu3 %v265_v18 }
  0x29   :  { %297 = vmatpush.msrb.mxu0 %v250_v51  ;;  %328 = vmatpush.msrb.mxu1 %v258_v53 }
  0x2a   :  { %197 = vmatpush.msra.mxu2 %v149_v61  ;;  %284 = vmatpush.msrb.mxu3 %v264_v39 }
  0x2b   :  { %298 = vmatpush.msrb.mxu0 %v249_v54  ;;  %329 = vmatpush.msrb.mxu1 %v257_v56 }
  0x2c   :  { %198 = vmatpush.msra.mxu2 %v148_v0  ;;  %285 = vmatpush.msrb.mxu3 %v263_v40  ;;  %v350_v0 = vstv %s377_s6 }
  0x2d   :  { %299 = vmatpush.msrb.mxu0 %v248_v57  ;;  %330 = vmatpush.msrb.mxu1 %v256_v62  ;;  %v405_v62 = vld [vmem:[%s790_s7] ss:$0 sm:$0xff]  ;;  %s448_s7 = smov 128  }
  0x2e   :  { %108 = vmatmul.f32.gmra.mxu0 %v50_v59  ;;  %131 = vmatmul.f32.gmra.mxu1 %v50_v59 }
  0x2f   :  { %300 = vmatpush.msrb.mxu0 %v247_v60  ;;  %384 = vmatpush.msrb.mxu2 %v251_v48  ;;  %v231_v48 = vstv %s376_s27 }
  0x30   :  { %331 = vmatpush.msrb.mxu1 %v255_v1  ;;  %286 = vmatpush.msrb.mxu3 %v262_v41 }
  0x31   :  { %301 = vmatpush.msrb.mxu0 %v246_v63  ;;  %385 = vmatpush.msrb.mxu2 %v250_v51 }
  0x32   :  { %332 = vmatpush.msrb.mxu1 %v254_v11  ;;  %287 = vmatpush.msrb.mxu3 %v261_v42 }
  0x33   :  { %302 = vmatpush.msrb.mxu0 %v245_v2  ;;  %386 = vmatpush.msrb.mxu2 %v249_v54 }
  0x34   :  { %333 = vmatpush.msrb.mxu1 %v253_v14  ;;  %288 = vmatpush.msrb.mxu3 %v260_v43 }
  0x35   :  { %303 = vmatpush.msrb.mxu0 %v244_v3  ;;  %387 = vmatpush.msrb.mxu2 %v248_v57 }
  0x36   :  { %334 = vmatpush.msrb.mxu1 %v252_v17 }
  0x37   :  { %304 = vmatpush.msrb.mxu0 %v243_v4  ;;  %388 = vmatpush.msrb.mxu2 %v247_v60 }
  0x39   :  { %305 = vmatpush.msrb.mxu0 %v242_v5  ;;  %389 = vmatpush.msrb.mxu2 %v246_v63 }
  0x3b   :  { %306 = vmatpush.msrb.mxu0 %v241_v6  ;;  %390 = vmatpush.msrb.mxu2 %v245_v2 }
  0x3d   :  { %307 = vmatpush.msrb.mxu0 %v240_v7  ;;  %391 = vmatpush.msrb.mxu2 %v244_v3 }
  0x3f   :  { %308 = vmatpush.msrb.mxu0 %v239_v8  ;;  %392 = vmatpush.msrb.mxu2 %v243_v4 }
  0x41   :  { %393 = vmatpush.msrb.mxu2 %v242_v5  ;;  %309 = vmatpush.msrb.mxu0 %v238_v10 }
  0x43   :  { %394 = vmatpush.msrb.mxu2 %v241_v6  ;;  %310 = vmatpush.msrb.mxu0 %v237_v13 }
  0x45   :  { %395 = vmatpush.msrb.mxu2 %v240_v7  ;;  %311 = vmatpush.msrb.mxu0 %v236_v16 }
  0x47   :  { %396 = vmatpush.msrb.mxu2 %v239_v8 }
  0x49   :  { %397 = vmatpush.msrb.mxu2 %v238_v10 }
  0x4b   :  { %398 = vmatpush.msrb.mxu2 %v237_v13 }
  0x4d   :  { %399 = vmatpush.msrb.mxu2 %v236_v16 }
  0xa3   :  { %v106_v22 = vpop.f32.mrf.mxu0  ;;  %v129_v23 = vpop.f32.mrf.mxu1 }
  0xa4   :  { %v107_v25 = vadd.f32 %v106_v22, %v85_v20  ;;  %v130_v26 = vadd.f32 %v129_v23, %v86_v21 }
  0xa6   :  { %v141_v27 = vmul.f32 %v139_v24, %v130_v26  ;;  %vm135_vm1 = vcmp.ge.f32.partialorder %v107_v25, 0.0  ;;  %v140_v28 = vmul.f32 %v139_v24, %v107_v25  ;;  %vm136_vm2 = vcmp.ge.f32.partialorder %v130_v26, 0.0 }
  0xa8   :  { %v144_v29 = vsel %vm135_vm1, %v107_v25, %v140_v28  ;;  %v145_v30 = vsel %vm136_vm2, %v130_v26, %v141_v27 }
  0xa9   :  { %199 = vmatmul.f32.vlgmr.msra.gmra.mxu2 %v144_v29  ;;  %378 = vmatmul.msk.f32.vlgmr.msra.gmra.mxu3 %vm176_vm0, %v145_v30 }
  0xaa   :  { %312 = vmatmul.f32.vlgmr.msrb.gmra.mxu0 %v144_v29  ;;  %382 = vmatmul.msk.f32.vlgmr.msrb.gmra.mxu1 %vm176_vm0, %v145_v30 }
  0xab   :  { %v109_v31 = vpop.f32.mrf.mxu0  ;;  %v132_v32 = vpop.f32.mrf.mxu1 }
  0xac   :  { %v110_v33 = vadd.f32 %v109_v31, %v85_v20  ;;  %v133_v34 = vadd.f32 %v132_v32, %v86_v21 }
  0xae   :  { %v143_v35 = vmul.f32 %v139_v24, %v133_v34  ;;  %vm137_vm3 = vcmp.ge.f32.partialorder %v110_v33, 0.0  ;;  %v142_v36 = vmul.f32 %v139_v24, %v110_v33  ;;  %vm138_vm4 = vcmp.ge.f32.partialorder %v133_v34, 0.0 }
  0xb0   :  { %v146_v37 = vsel %vm137_vm3, %v110_v33, %v142_v36  ;;  %v147_v38 = vsel %vm138_vm4, %v133_v34, %v143_v35 }
  0xb1   :  { %202 = vmatmul.f32.gmra.mxu2 %v146_v37  ;;  %379 = vmatmul.msk.f32.gmra.mxu3 %vm176_vm0, %v147_v38 }
  0xb2   :  { %383 = vmatmul.msk.f32.gmra.mxu1 %vm176_vm0, %v147_v38 }
  0xb9   :  { %315 = vmatmul.f32.vlgmr.msrb.gmra.mxu2 %v146_v37 }
 0x127   :  { %v313_v58 = vpop.f32.mrf.mxu0  ;;  %v336_v59 = vpop.f32.mrf.mxu1 }
 0x12c   :  { %v200_v45 = vpop.f32.mrf.mxu2  ;;  %v223_v46 = vpop.f32.mrf.mxu3 }
 0x12d   :  { %v201_v47 = vadd.f32 %v404_v44, %v200_v45 }
 0x12f   :  { %v224_v49 = vadd.f32 %v223_v46, %v201_v47  ;;  %v339_v7 = vpop.f32.mrf.mxu1 }
 0x131   :  { %vm229_vm5 = vcmp.ge.f32.partialorder %v224_v49, 0.0  ;;  %v232_v50 = vmul.f32 %v231_v48, %v224_v49 }
 0x133   :  { %v234_v51 = vsel %vm229_vm5, %v224_v49, %v232_v50 }
 0x134   :  { %v203_v52 = vpop.f32.mrf.mxu2  ;;  %380 = vmatmul.msk.f32.vlgmr.msrb.gmra.mxu3 %vm266_vm6, %v234_v51  ;;  %v226_v54 = vpop.f32.mrf.mxu3 }
 0x135   :  { %v204_v53 = vadd.f32 %v404_v44, %v203_v52 }
 0x137   :  { %v227_v55 = vadd.f32 %v226_v54, %v204_v53 }
 0x139   :  { %v233_v56 = vmul.f32 %v231_v48, %v227_v55  ;;  %vm230_vm7 = vcmp.ge.f32.partialorder %v227_v55, 0.0 }
 0x13b   :  { %v235_v57 = vsel %vm230_vm7, %v227_v55, %v233_v56 }
 0x13c   :  { %381 = vmatmul.msk.f32.gmra.mxu3 %vm266_vm6, %v235_v57  ;;  %v316_v3 = vpop.f32.mrf.mxu2 }
 0x1b7   :  { %v290_v60 = vpop.f32.mrf.mxu3 }
 0x1b8   :  { %v314_v61 = vadd.f32 %v313_v58, %v290_v60 }
 0x1ba   :  { %v337_v63 = vadd.f32 %v336_v59, %v314_v61 }
 0x1bc   :  { %v346_v1 = vadd.f32 %v405_v62, %v337_v63 }
 0x1be   :  { %vm348_vm8 = vcmp.ge.f32.partialorder %v346_v1, 0.0  ;;  %v351_v2 = vmul.f32 %v350_v0, %v346_v1 }
 0x1bf   :  { %v293_v4 = vpop.f32.mrf.mxu3 }
 0x1c0   :  { %v317_v5 = vadd.f32 %v316_v3, %v293_v4  ;;  %v353_v6 = vsel %vm348_vm8, %v346_v1, %v351_v2 }
 0x1c1   :  { %355 = vst [vmem:[#allocation5] sm:$0xff] %v353_v6 }
 0x1c2   :  { %v340_v8 = vadd.f32 %v339_v7, %v317_v5 }
 0x1c4   :  { %v347_v9 = vadd.f32 %v405_v62, %v340_v8 }
 0x1c6   :  { %vm349_vm9 = vcmp.ge.f32.partialorder %v347_v9, 0.0  ;;  %v352_v10 = vmul.f32 %v350_v0, %v347_v9 }
 0x1c8   :  { %v354_v11 = vsel %vm349_vm9, %v347_v9, %v352_v10 }
 0x1c9   :  { %356 = vst [vmem:[#allocation5 + $0x8] sm:$0xff] %v354_v11 }
 0x1ca   :  { %369 = dma.vmem_to_hbm [thread:$0]  %s362_s11, 256, %s364_s14, [#allocation3], %s448_s7, %s448_s7, %s449_s15  }
 0x1cb   :  { %444 = dma.done.wait [#allocation3], 256  }
 0x1cc   :  { %445 = vsyncadd [#allocation3], 4294967040 }
 0x1cd   :  { %374 = vsyncpa [#allocation3], 1 }
 0x1ce   :  { %375 = vsyncpa [#allocation4], 1 }

</bundles_post_ra>
